<compile_context>
chip_gen: v7x
topology: tpu7x:2x2x1
jax: 0.10.0
libtpu: 0.0.40
codegen_flags: <defaults>
</compile_context>

<pallas_src>
import functools
import math

import jax
import jax.numpy as jnp
from jax.experimental import pallas as pl
from jax.experimental.pallas import tpu as pltpu


def _int_pow(x, n):
    """x ** n for a static positive Python int n, using only VPU multiplies."""
    acc = None
    base = x
    while n > 0:
        if n & 1:
            acc = base if acc is None else acc * base
        n >>= 1
        if n:
            base = base * base
    return acc


def _gem_rows_kernel(p_ref, x_ref, o_ref, *, eps, inv_hw, static_p):
    # p_ref : SMEM scalar parameter, shape (1,)   (unused on the static-p path)
    # x_ref : VMEM tile (tm, H*W) in native dtype (math in f32)
    # o_ref : VMEM tile (tm, 1)
    x = jnp.maximum(x_ref[...].astype(jnp.float32), eps)   # clamp(min=eps) -> x > 0
    if static_p is not None:
        xp = _int_pow(x, static_p)                          # VPU multiplies only
        inv_p = 1.0 / static_p
    else:
        p = p_ref[0]
        xp = jnp.exp(p * jnp.log(x))                        # x ** p (safe: x > 0)
        inv_p = 1.0 / p
    m = jnp.sum(xp, axis=-1, keepdims=True) * inv_hw        # mean over H*W
    o_ref[...] = jnp.exp(jnp.log(m) * inv_p).astype(o_ref.dtype)   # m ** (1/p)


def _gem_packed_kernel(p_ref, x_ref, ones_ref, o_ref, *, eps, inv_hw, static_p):
    # x_ref    : VMEM tile (tm, k*H*W) with k feature maps packed per row
    # ones_ref : (k*H*W, k) block-diagonal ones (constant index_map -> resident)
    # o_ref    : VMEM tile (tm, k), lane-dense
    x = jnp.maximum(x_ref[...].astype(jnp.float32), eps)
    if static_p is not None:
        xp = _int_pow(x, static_p)
        inv_p = 1.0 / static_p
    else:
        p = p_ref[0]
        xp = jnp.exp(p * jnp.log(x))
        inv_p = 1.0 / p
    # Per-map segmented sum on the (otherwise idle) MXU -> lane-dense (tm, k).
    sums = jnp.dot(xp, ones_ref[...], preferred_element_type=jnp.float32,
                   precision=jax.lax.Precision.HIGHEST)
    m = sums * inv_hw
    o_ref[...] = jnp.exp(jnp.log(m) * inv_p).astype(o_ref.dtype)


def _round_up(v, m):
    return ((v + m - 1) // m) * m


def _static_int_p(p):
    """Return p as a Python int if it is a concrete small positive integer, else None."""
    try:
        pv = float(jnp.asarray(p).reshape(-1)[0])
    except (jax.errors.ConcretizationTypeError, jax.errors.TracerArrayConversionError):
        return None
    if pv > 0 and pv == round(pv) and round(pv) <= 16:
        return int(round(pv))
    return None


def _choose_tm(rows, row_bytes, target_tile_bytes=4 * 1024 * 1024, min_grid_steps=8):
    # ~4 MiB tiles sit at >=86% of the HBM roofline on v5e/v6e and, double
    # buffered plus f32 temporaries, stay well inside the 32 MiB scoped budget
    # (v7x: 64 MiB physical VMEM).
    tm = max(8, (target_tile_bytes // row_bytes) // 8 * 8)
    # Cap so the grid keeps >= min_grid_steps steps, letting v7x shard the
    # "parallel" row axis across both TensorCores even for small N*C.
    tm = min(tm, max(8, _round_up(pl.cdiv(rows, min_grid_steps), 8)))
    if tm >= rows:
        tm = rows   # full-extent block: satisfies the (8,128) sublane rule
    return tm


def gem(x, p, eps=1e-6):
    """GeM pooling. x: (N, C, H, W); p: scalar / (1,) parameter. Returns (N, C, 1, 1)."""
    N, C, H, W = x.shape
    rows, hw = N * C, H * W
    itemsize = jnp.dtype(x.dtype).itemsize
    p_arr = jnp.asarray(p, jnp.float32).reshape(-1)[:1]
    static_p = _static_int_p(p)

    compiler_params = pltpu.CompilerParams(
        dimension_semantics=("parallel",),        # shard row tiles across TCs (v7x)
        vmem_limit_bytes=32 * 1024 * 1024,        # explicit budget, safe on 64 MiB v7x
    )

    # Maps per packed row needed for lane-dense tiles.
    k = 128 // math.gcd(hw, 128)
    if hw % 128 != 0 and k > 1 and rows % k == 0:
        # ---- Packed path: lane-dense tiles + MXU segmented per-map sum ----
        prows, pcols = rows // k, k * hw
        x2 = x.reshape(prows, pcols)              # free: row-major packing of k maps/row
        seg = jnp.repeat(jnp.arange(k, dtype=jnp.int32), hw)
        ones_bd = (seg[:, None] == jnp.arange(k, dtype=jnp.int32)[None, :]).astype(jnp.float32)
        tm = _choose_tm(prows, pcols * itemsize)
        out = pl.pallas_call(
            functools.partial(_gem_packed_kernel, eps=eps, inv_hw=1.0 / hw, static_p=static_p),
            out_shape=jax.ShapeDtypeStruct((prows, k), x.dtype),
            grid=(pl.cdiv(prows, tm),),
            in_specs=[
                pl.BlockSpec(memory_space=pltpu.SMEM),         # p (scalar parameter)
                pl.BlockSpec((tm, pcols), lambda i: (i, 0)),   # packed row tile
                pl.BlockSpec((pcols, k), lambda i: (0, 0)),    # resident block-diag ones
            ],
            out_specs=pl.BlockSpec((tm, k), lambda i: (i, 0)),  # lane-dense output
            compiler_params=compiler_params,
        )(p_arr, x2, ones_bd)
        return out.reshape(N, C, 1, 1)

    # ---- Plain path: one map per row, full reduction axis on lanes --------
    x2 = x.reshape(rows, hw)                       # free: NCHW contiguous in (N*C, H*W)
    tm = _choose_tm(rows, _round_up(hw, 128) * itemsize)
    out = pl.pallas_call(
        functools.partial(_gem_rows_kernel, eps=eps, inv_hw=1.0 / hw, static_p=static_p),
        out_shape=jax.ShapeDtypeStruct((rows, 1), x.dtype),
        grid=(pl.cdiv(rows, tm),),
        in_specs=[
            pl.BlockSpec(memory_space=pltpu.SMEM),             # p (scalar parameter)
            pl.BlockSpec((tm, hw), lambda i: (i, 0)),          # row tile, full reduction axis
        ],
        # (tm, 1) store is masked, but the output is H*W times smaller than the
        # input, so the store path is far below the roofline.
        out_specs=pl.BlockSpec((tm, 1), lambda i: (i, 0)),
        compiler_params=compiler_params,
    )(p_arr, x2)
    return out.reshape(N, C, 1, 1)


def gem_ref(x, p, eps=1e-6):
    pv = jnp.asarray(p, jnp.float32).reshape(-1)[0]
    xc = jnp.maximum(x.astype(jnp.float32), eps)
    return (jnp.mean(xc ** pv, axis=(2, 3), keepdims=True) ** (1.0 / pv)).astype(x.dtype)


if __name__ == "__main__":
    key = jax.random.PRNGKey(0)
    k1, k2, k3 = jax.random.split(key, 3)
    eps = 1e-6

    # Module-default parameter: nn.Parameter(torch.ones(1) * 3).
    p3 = jnp.ones((1,), dtype=jnp.float32) * 3.0

    # 1) Spec-sized example (2, 4, 16, 16): H*W lane-aligned, integer-p fast path.
    x1 = jax.random.normal(k1, (2, 4, 16, 16), dtype=jnp.float32)
    y1 = gem(x1, p3, eps)
    jax.block_until_ready(y1)
    assert y1.shape == (2, 4, 1, 1)
    assert jnp.allclose(y1, gem_ref(x1, p3, eps), rtol=1e-4, atol=1e-5)

    # 2) ResNet-style 7x7 maps (H*W=49, not a multiple of 128): packed-lane path
    #    with the MXU segmented sum (N*C divisible by k=128).
    x2 = jax.random.normal(k2, (2, 128, 7, 7), dtype=jnp.float32)
    y2 = gem(x2, p3, eps)
    jax.block_until_ready(y2)
    assert y2.shape == (2, 128, 1, 1)
    assert jnp.allclose(y2, gem_ref(x2, p3, eps), rtol=1e-4, atol=1e-5)

    # 3) Non-integer p and N*C not divisible by k: generic exp/log path with a
    #    lane-padded (masked) reduction over H*W=49.
    p25 = jnp.ones((1,), dtype=jnp.float32) * 2.5
    x3 = jax.random.normal(k3, (2, 3, 7, 7), dtype=jnp.float32)
    y3 = gem(x3, p25, eps)
    jax.block_until_ready(y3)
    assert y3.shape == (2, 3, 1, 1)
    assert jnp.allclose(y3, gem_ref(x3, p25, eps), rtol=1e-4, atol=1e-5)

    print("KERNEL_OK")
</pallas_src>

<mosaic_0001>
module attributes {stable_mosaic.version = 11 : i64} {
  func.func @_gem_rows_kernel(%arg0: i32, %arg1: memref<1xf32, #tpu.memory_space<smem>>, %arg2: memref<8x256xf32, #tpu.memory_space<vmem>>, %arg3: memref<8x1xf32, #tpu.memory_space<vmem>>) attributes {dimension_semantics = [#tpu.dimension_semantics<parallel>], iteration_bounds = array<i64: 1>, scalar_prefetch = 0 : i64, scratch_operands = 0 : i64, tpu.core_type = #tpu.core_type<tc>, window_params = [{transform_indices = @transform_0, window_bounds = array<i64: 1>}, {transform_indices = @transform_1, window_bounds = array<i64: 8, 256>}, {transform_indices = @transform_2, window_bounds = array<i64: 8, 1>}]} {
    %c0 = arith.constant 0 : index
    %c0_0 = arith.constant 0 : index
    %0 = vector.load %arg2[%c0, %c0_0] : memref<8x256xf32, #tpu.memory_space<vmem>>, vector<8x256xf32>
    %cst = arith.constant 9.99999997E-7 : f32
    %1 = vector.broadcast %cst : f32 to vector<8x256xf32>
    %2 = arith.maximumf %0, %1 : vector<8x256xf32>
    %3 = arith.mulf %2, %2 : vector<8x256xf32>
    %4 = arith.mulf %2, %3 : vector<8x256xf32>
    %cst_1 = arith.constant dense<0.000000e+00> : vector<8xf32>
    %5 = vector.multi_reduction <add>, %4, %cst_1 [1] : vector<8x256xf32> to vector<8xf32>
    %6 = vector.shape_cast %5 : vector<8xf32> to vector<8x1xf32>
    %cst_2 = arith.constant 3.906250e-03 : f32
    %7 = vector.broadcast %cst_2 : f32 to vector<8x1xf32>
    %8 = arith.mulf %6, %7 : vector<8x1xf32>
    %9 = math.log %8 : vector<8x1xf32>
    %cst_3 = arith.constant 0.333333343 : f32
    %10 = vector.broadcast %cst_3 : f32 to vector<8x1xf32>
    %11 = arith.mulf %9, %10 : vector<8x1xf32>
    %12 = math.exp %11 : vector<8x1xf32>
    %c0_4 = arith.constant 0 : index
    %c0_5 = arith.constant 0 : index
    %13 = vector.load %arg3[%c0_4, %c0_5] : memref<8x1xf32, #tpu.memory_space<vmem>>, vector<8x1xf32>
    tpu.vector_store %arg3[%c0_4, %c0_5], %12 {strides = array<i32>} : memref<8x1xf32, #tpu.memory_space<vmem>>, vector<8x1xf32>,
    return
  }
  func.func @transform_0(%arg0: i32) -> i32 {
    %c0_i32 = arith.constant 0 : i32
    %c0_i32_0 = arith.constant 0 : i32
    return %c0_i32 : i32
  }
  func.func @transform_1(%arg0: i32) -> (i32, i32) {
    %c0_i32 = arith.constant 0 : i32
    %c0_i32_0 = arith.constant 0 : i32
    return %arg0, %c0_i32 : i32, i32
  }
  func.func @transform_2(%arg0: i32) -> (i32, i32) {
    %c0_i32 = arith.constant 0 : i32
    %c0_i32_0 = arith.constant 0 : i32
    return %arg0, %c0_i32 : i32, i32
  }
}

</mosaic_0001>

<bundles_post_ra>
// kernel: tpu_custom_call.1
= control target key start
LH: loop header
LB: loop body
LE: loop exit
PB: predicated region body
PF: predicated region fallthrough
CT: control target
= control target key end

     0   :  { %8 = vsyncpa [#allocation4], 0  ;;  %s77_s9 = smov [#allocation3]   ;;  %s108_s0 = inlined_call_operand.<no memory space> [shape: f32[1], index: 0, kind: input, shape index: {}]   ;;  %s109_s1 = inlined_call_operand.hbm [shape: f32[8,256], index: 1, kind: input, shape index: {}]   ;;  %s110_s2 = inlined_call_operand.vmem [shape: f32[8,1], index: 2, kind: output, shape index: {}]  }
   0x1   :  { %s17_s10 = sshll.u32 %s77_s9, 4  ;;  %s53_s13 = scalar_lea.hbm %s109_s1, 256  ;;  %s18_s10 = int_to_ptr.vmem [resolvable:$true] %s17_s10 }
   0x2   :  { %p54_p0 = scmp.ne.s32.totalorder %s109_s1, %s53_s13  ;;  %p57_p1 = scmp.lt.u32.totalorder %s53_s13, %s109_s1 }
   0x4   :  { %p59_p2 = pnand %p57_p1, %p54_p0 }
   0x6   :  { %62 = shalt.err (!%p59_p2)
}
   0x7   :  { %s63_s17 = scalar_lea.vmem %s18_s10, 256  ;;  %p68_p4 = scmp.lt.s32.totalorder %s18_s10, %s18_s10 }
   0x8   :  { %p64_p3 = scmp.ne.s32.totalorder %s18_s10, %s63_s17  ;;  %p69_p5 = scmp.lt.s32.totalorder %s63_s17, %s63_s17 }
   0xa   :  { %p70_p6 = por %p69_p5, %p68_p4 }
   0xc   :  { %p71_p7 = pnand %p70_p6, %p64_p3 }
   0xe   :  { %74 = shalt.err (!%p71_p7)
}
   0xf   :  { %20 = dma.hbm_to_vmem [thread:$0]  %s109_s1, 256, %s18_s10, [#allocation4]  }
  0x10   :  { %75 = dma.done.wait [#allocation4], 256  }
  0x11   :  { %76 = vsyncadd [#allocation4], 4294967040  ;;  %v24_v0 = vld [vmem:[#allocation3] sm:$0xff]  ;;  %v25_v1 = vld [vmem:[#allocation3 + $0x8] sm:$0xff]  ;;  %vm41_vm0 = vcmask 7168  }
  0x12   :  { %v26_v2 = vmax.f32 %v24_v0, 1e-06  ;;  %v27_v3 = vmax.f32 %v25_v1, 1e-06 }
  0x14   :  { %v28_v4 = vmul.f32 %v26_v2, %v26_v2  ;;  %v29_v5 = vmul.f32 %v27_v3, %v27_v3 }
  0x16   :  { %v30_v6 = vmul.f32 %v28_v4, %v26_v2  ;;  %v31_v7 = vmul.f32 %v29_v5, %v27_v3 }
  0x18   :  { %v32_v8 = vadd.f32 %v31_v7, %v30_v6 }
  0x1a   :  { %33 = vadd.xlane.f32.xlu0 %v32_v8 }
  0xa7   :  { %v34_v9 = vpop.xlane.xlu0 %33 }
  0xa8   :  { %v35_v10 = vmul.f32 0.00390625, %v34_v9 }
  0xaa   :  { %49 = vlog2.f32 %v35_v10 }
  0xb4   :  { %v50_v11 = vpop.eup %49 }
  0xb5   :  { %v37_v12 = vmul.f32 0.6931472, %v50_v11 }
  0xb7   :  { %v38_v13 = vmul.f32 0.33333334, %v37_v12 }
  0xb9   :  { %v39_v14 = vmul.f32 1.442695, %v38_v13 }
  0xbb   :  { %51 = vpow2.f32 %v39_v14 }
  0xc5   :  { %v52_v15 = vpop.eup %51 }
  0xc6   :  { %42 = vst.msk [vmem:[%s110_s2] sm:$0xff] %vm41_vm0, %v52_v15 }
  0xc7   :  { %47 = vsyncpa [#allocation4], 1 }

</bundles_post_ra>
